<compile_context>
chip_gen: v5e
topology: v5e:2x2
jax: 0.10.0
libtpu: 0.0.40
codegen_flags: <defaults>
</compile_context>

<pallas_src>
import functools

import jax
import jax.numpy as jnp
from jax.experimental import pallas as pl
from jax.experimental.pallas import tpu as pltpu

LANE = 128                              # TPU lane width (last dim)
SUBLANE = 8                             # sublane tile rows
ALIGN = SUBLANE * LANE                  # (8,128) alignment = 1024 elements
TARGET_BLOCK_BYTES = 4 * 1024 * 1024    # ~4 MiB per input per grid step


def _partials_kernel(pred_ref, targ_ref, out_ref, *,
                     valid_rows, tile_rows, ragged):
    """One grid step: reduce a (tile_rows, LANE) slab of both inputs into
    per-lane partial sums written to this step's (1, 3, LANE) output block:
        row 0: sum |p - t|
        row 1: sum |p - t| where p < t
        row 2: count (p < t)
    Steps are independent (no carried state) so the grid axis is "parallel".
    """
    pid = pl.program_id(0)

    p = pred_ref[...].astype(jnp.float32)
    t = targ_ref[...].astype(jnp.float32)
    absd = jnp.abs(p - t)
    lower = p < t
    pen = jnp.where(lower, absd, 0.0)
    cnt = jnp.where(lower, 1.0, 0.0)

    def write(a, b, c):
        out_ref[0, 0:1, :] = jnp.sum(a, axis=0, keepdims=True)
        out_ref[0, 1:2, :] = jnp.sum(b, axis=0, keepdims=True)
        out_ref[0, 2:3, :] = jnp.sum(c, axis=0, keepdims=True)

    if ragged:
        last = pl.num_programs(0) - 1

        @pl.when(pid == last)
        def _masked():
            # Last block overhangs the real rows: out-of-bounds rows hold
            # unspecified data (possibly NaN/Inf).  Discard them with selects
            # (never mask-multiplies: 0 * NaN = NaN).
            row = jax.lax.broadcasted_iota(jnp.int32, (tile_rows, LANE), 0)
            valid = (pid * tile_rows + row) < valid_rows
            write(jnp.where(valid, absd, 0.0),
                  jnp.where(valid, pen, 0.0),
                  jnp.where(valid, cnt, 0.0))

        @pl.when(pid != last)
        def _fast():
            write(absd, pen, cnt)
    else:
        # Zero padding (if any) is inert: |0-0| = 0, 0 < 0 = False.
        write(absd, pen, cnt)


def penalized_lower_prediction_loss(predictions, targets, penalty_factor=2.0,
                                    *, max_block_bytes=TARGET_BLOCK_BYTES):
    """JAX/Pallas equivalent of PenalizedLowerPredictionLoss(use_mae=True)."""
    assert predictions.shape == targets.shape
    total = int(predictions.size)
    assert total > 0

    # Flatten; pad only up to the (8,128) alignment (<= 1023 elements), never
    # to a full tile multiple.
    flat_p = predictions.reshape(-1)
    flat_t = targets.reshape(-1)
    padded = pl.cdiv(total, ALIGN) * ALIGN
    if padded != total:
        # TODO(synk): for very large unaligned tensors, process the aligned
        # prefix copy-free and correct the <1024-element tail separately to
        # avoid this full pad copy (3x HBM traffic on this path).
        flat_p = jnp.pad(flat_p, (0, padded - total))
        flat_t = jnp.pad(flat_t, (0, padded - total))
    rows = padded // LANE                       # multiple of SUBLANE
    p2 = flat_p.reshape(rows, LANE)
    t2 = flat_t.reshape(rows, LANE)

    # Size the block in BYTES (dtype-aware): ~4 MiB per input per grid step.
    itemsize = max(jnp.dtype(predictions.dtype).itemsize,
                   jnp.dtype(targets.dtype).itemsize)
    max_rows = max(SUBLANE,
                   (max_block_bytes // (LANE * itemsize)) // SUBLANE * SUBLANE)
    tile_rows = min(max_rows, rows)             # multiple of SUBLANE
    grid = pl.cdiv(rows, tile_rows)
    ragged = (rows % tile_rows) != 0

    kernel = functools.partial(_partials_kernel, valid_rows=rows,
                               tile_rows=tile_rows, ragged=ragged)

    partials = pl.pallas_call(
        kernel,
        out_shape=jax.ShapeDtypeStruct((grid, 3, LANE), jnp.float32),
        grid_spec=pltpu.PrefetchScalarGridSpec(
            num_scalar_prefetch=0,
            grid=(grid,),
            in_specs=[
                pl.BlockSpec((tile_rows, LANE), lambda i: (i, 0)),
                pl.BlockSpec((tile_rows, LANE), lambda i: (i, 0)),
            ],
            out_specs=pl.BlockSpec((1, 3, LANE), lambda i: (i, 0, 0)),
        ),
        compiler_params=pltpu.CompilerParams(
            dimension_semantics=("parallel",),
            # 2 inputs x 2 pipeline buffers x ~4 MiB = ~16 MiB of input
            # buffers; 32 MiB raises v5e's 16 MiB default while staying safe
            # on v7x (64 MiB physical VMEM per TensorCore).
            vmem_limit_bytes=32 * 1024 * 1024,
        ),
    )(p2, t2)

    # Tiny final combine in the wrapper (portable across 1-TC and 2-TC chips).
    sums = jnp.sum(partials, axis=(0, 2))       # (3,) f32
    base_loss = sums[0] / jnp.float32(total)
    penalty_loss = sums[1] / sums[2]            # 0/0 -> NaN == torch.mean(empty)
    return base_loss + jnp.float32(penalty_factor) * penalty_loss


def _reference_loss(predictions, targets, penalty_factor=2.0):
    p = predictions.astype(jnp.float32)
    t = targets.astype(jnp.float32)
    diff = jnp.abs(p - t)
    base = jnp.mean(diff)
    mask = p < t
    penalty = jnp.sum(jnp.where(mask, diff, 0.0)) / jnp.sum(mask.astype(jnp.float32))
    return base + penalty_factor * penalty


if __name__ == "__main__":
    # Module-level `penalty_factor = 3.0` in the source file.
    PENALTY_FACTOR = 3.0
    key = jax.random.PRNGKey(0)

    # (shape, dtype, max_block_bytes override to exercise multi-block/ragged,
    #  tolerance)
    cases = [
        ((2, 4, 16, 16), jnp.float32, None, 1e-5),       # tiny NCHW map, 1 block
        ((2, 4, 128, 257), jnp.float32, 128 * 1024, 1e-5),  # multi-block, ragged tail
        ((2, 3, 7, 11), jnp.float32, None, 1e-5),        # unaligned -> minimal pad
        ((2, 4, 16, 16), jnp.bfloat16, None, 1e-4),      # bf16 inputs, f32 accum
    ]
    for idx, (shape, dtype, blk, tol) in enumerate(cases):
        kp, kt = jax.random.split(jax.random.fold_in(key, idx))
        predictions = jax.random.normal(kp, shape, dtype=dtype)
        targets = jax.random.normal(kt, shape, dtype=dtype)

        kwargs = {} if blk is None else {"max_block_bytes": blk}
        loss = penalized_lower_prediction_loss(
            predictions, targets, PENALTY_FACTOR, **kwargs)
        loss = jax.block_until_ready(loss)

        ref = _reference_loss(predictions, targets, PENALTY_FACTOR)
        assert jnp.allclose(loss, ref, rtol=tol, atol=tol), (shape, loss, ref)

    print("KERNEL_OK")
</pallas_src>

<mosaic_0001>
module attributes {stable_mosaic.version = 11 : i64} {
  func.func @_partials_kernel(%arg0: i32, %arg1: memref<16x128xf32, #tpu.memory_space<vmem>>, %arg2: memref<16x128xf32, #tpu.memory_space<vmem>>, %arg3: memref<1x3x128xf32, #tpu.memory_space<vmem>>) attributes {dimension_semantics = [#tpu.dimension_semantics<parallel>], iteration_bounds = array<i64: 1>, scalar_prefetch = 0 : i64, scratch_operands = 0 : i64, tpu.core_type = #tpu.core_type<tc>, window_params = [{transform_indices = @transform_0, window_bounds = array<i64: 16, 128>}, {transform_indices = @transform_1, window_bounds = array<i64: 16, 128>}, {transform_indices = @transform_2, window_bounds = array<i64: 1, 3, 128>}]} {
    %c0 = arith.constant 0 : index
    %c0_0 = arith.constant 0 : index
    %0 = vector.load %arg1[%c0, %c0_0] : memref<16x128xf32, #tpu.memory_space<vmem>>, vector<16x128xf32>
    %c0_1 = arith.constant 0 : index
    %c0_2 = arith.constant 0 : index
    %1 = vector.load %arg2[%c0_1, %c0_2] : memref<16x128xf32, #tpu.memory_space<vmem>>, vector<16x128xf32>
    %2 = arith.subf %0, %1 : vector<16x128xf32>
    %3 = math.absf %2 : vector<16x128xf32>
    %4 = arith.cmpf olt, %0, %1 : vector<16x128xf32>
    %cst = arith.constant 0.000000e+00 : f32
    %5 = vector.broadcast %cst : f32 to vector<16x128xf32>
    %6 = arith.select %4, %3, %5 : vector<16x128xi1>, vector<16x128xf32>
    %cst_3 = arith.constant 1.000000e+00 : f32
    %cst_4 = arith.constant 0.000000e+00 : f32
    %7 = vector.broadcast %cst_3 : f32 to vector<16x128xf32>
    %8 = vector.broadcast %cst_4 : f32 to vector<16x128xf32>
    %9 = arith.select %4, %7, %8 : vector<16x128xi1>, vector<16x128xf32>
    %cst_5 = arith.constant dense<0.000000e+00> : vector<128xf32>
    %10 = vector.multi_reduction <add>, %3, %cst_5 [0] : vector<16x128xf32> to vector<128xf32>
    %11 = vector.shape_cast %10 : vector<128xf32> to vector<1x128xf32>
    %c0_6 = arith.constant 0 : index
    %c0_7 = arith.constant 0 : index
    %c0_8 = arith.constant 0 : index
    %12 = vector.load %arg3[%c0_6, %c0_7, %c0_8] : memref<1x3x128xf32, #tpu.memory_space<vmem>>, vector<1x1x128xf32>
    %13 = vector.shape_cast %12 : vector<1x1x128xf32> to vector<1x128xf32>
    %14 = vector.shape_cast %11 : vector<1x128xf32> to vector<1x1x128xf32>
    tpu.vector_store %arg3[%c0_6, %c0_7, %c0_8], %14 {strides = array<i32>} : memref<1x3x128xf32, #tpu.memory_space<vmem>>, vector<1x1x128xf32>,
    %cst_9 = arith.constant dense<0.000000e+00> : vector<128xf32>
    %15 = vector.multi_reduction <add>, %6, %cst_9 [0] : vector<16x128xf32> to vector<128xf32>
    %16 = vector.shape_cast %15 : vector<128xf32> to vector<1x128xf32>
    %c0_10 = arith.constant 0 : index
    %c1 = arith.constant 1 : index
    %c0_11 = arith.constant 0 : index
    %17 = vector.load %arg3[%c0_10, %c1, %c0_11] : memref<1x3x128xf32, #tpu.memory_space<vmem>>, vector<1x1x128xf32>
    %18 = vector.shape_cast %17 : vector<1x1x128xf32> to vector<1x128xf32>
    %19 = vector.shape_cast %16 : vector<1x128xf32> to vector<1x1x128xf32>
    tpu.vector_store %arg3[%c0_10, %c1, %c0_11], %19 {strides = array<i32>} : memref<1x3x128xf32, #tpu.memory_space<vmem>>, vector<1x1x128xf32>,
    %cst_12 = arith.constant dense<0.000000e+00> : vector<128xf32>
    %20 = vector.multi_reduction <add>, %9, %cst_12 [0] : vector<16x128xf32> to vector<128xf32>
    %21 = vector.shape_cast %20 : vector<128xf32> to vector<1x128xf32>
    %c0_13 = arith.constant 0 : index
    %c2 = arith.constant 2 : index
    %c0_14 = arith.constant 0 : index
    %22 = vector.load %arg3[%c0_13, %c2, %c0_14] : memref<1x3x128xf32, #tpu.memory_space<vmem>>, vector<1x1x128xf32>
    %23 = vector.shape_cast %22 : vector<1x1x128xf32> to vector<1x128xf32>
    %24 = vector.shape_cast %21 : vector<1x128xf32> to vector<1x1x128xf32>
    tpu.vector_store %arg3[%c0_13, %c2, %c0_14], %24 {strides = array<i32>} : memref<1x3x128xf32, #tpu.memory_space<vmem>>, vector<1x1x128xf32>,
    return
  }
  func.func @transform_0(%arg0: i32) -> (i32, i32) {
    %c0_i32 = arith.constant 0 : i32
    %c0_i32_0 = arith.constant 0 : i32
    return %arg0, %c0_i32 : i32, i32
  }
  func.func @transform_1(%arg0: i32) -> (i32, i32) {
    %c0_i32 = arith.constant 0 : i32
    %c0_i32_0 = arith.constant 0 : i32
    return %arg0, %c0_i32 : i32, i32
  }
  func.func @transform_2(%arg0: i32) -> (i32, i32, i32) {
    %c0_i32 = arith.constant 0 : i32
    %c0_i32_0 = arith.constant 0 : i32
    %c0_i32_1 = arith.constant 0 : i32
    return %arg0, %c0_i32, %c0_i32_0 : i32, i32, i32
  }
}

</mosaic_0001>

<bundles_post_ra>
// kernel: tpu_custom_call.1
= control target key start
LH: loop header
LB: loop body
LE: loop exit
PB: predicated region body
PF: predicated region fallthrough
CT: control target
= control target key end

     0   :  { %7 = vsyncpa [#allocation3], 0  ;;  %s179_s0 = inlined_call_operand.hbm [shape: f32[16,128], index: 0, kind: input, shape index: {}]   ;;  %s180_s1 = inlined_call_operand.hbm [shape: f32[16,128], index: 1, kind: input, shape index: {}]   ;;  %s181_s2 = inlined_call_operand.vmem [shape: f32[1,3,128], index: 2, kind: output, shape index: {}]  }
   0x1   :  { %s13_s11 = sshll.u32 %s179_s0, 4  ;;  %s14_s11 = int_to_ptr.hbm [resolvable:$true] %s13_s11 }
   0x2   :  { %8 = vsyncpa [#allocation5], 0  ;;  %s144_s12 = smov [#allocation2]   ;;  %s26_s16 = sshll.u32 %s180_s1, 4  ;;  %s27_s16 = int_to_ptr.hbm [resolvable:$true] %s26_s16 }
   0x3   :  { %s15_s13 = sshll.u32 %s144_s12, 4  ;;  %s145_s17 = smov 128   ;;  %s16_s13 = int_to_ptr.vmem [resolvable:$true] %s15_s13 }
   0x4   :  { %s146_s18 = smov 8   ;;  %s147_s19 = smov [#allocation4]  }
   0x5   :  { %21 = dma.hbm_to_vmem [thread:$0]  %s14_s11, 256, %s16_s13, [#allocation3], %s145_s17, %s145_s17, %s146_s18  }
   0x6   :  { %s28_s20 = sshll.u32 %s147_s19, 4  ;;  %s29_s20 = int_to_ptr.vmem [resolvable:$true] %s28_s20 }
   0x7   :  { %34 = dma.hbm_to_vmem [thread:$0]  %s27_s16, 256, %s29_s20, [#allocation5], %s145_s17, %s145_s17, %s146_s18  }
   0x8   :  { %140 = dma.done.wait [#allocation3], 256  }
   0x9   :  { %141 = vsyncadd [#allocation3], 4294967040 }
   0xa   :  { %142 = dma.done.wait [#allocation5], 256  }
   0xb   :  { %143 = vsyncadd [#allocation5], 4294967040  ;;  %v43_v0 = vld [vmem:[#allocation2] sm:$0xff]  ;;  %v44_v1 = vld [vmem:[#allocation2 + $0x8] sm:$0xff]  ;;  %v148_v6 = vmov 0.0  }
   0xc   :  { %v45_v2 = vld [vmem:[#allocation4] sm:$0xff]  ;;  %v46_v3 = vld [vmem:[#allocation4 + $0x8] sm:$0xff] }
   0xd   :  { %v47_v4 = vsub.f32 %v43_v0, %v45_v2  ;;  %vm51_vm0 = vcmp.lt.f32.partialorder %v43_v0, %v45_v2  ;;  %v48_v5 = vsub.f32 %v44_v1, %v46_v3  ;;  %vm52_vm1 = vcmp.lt.f32.partialorder %v44_v1, %v46_v3 }
   0xe   :  { %v55_v7 = vsel %vm51_vm0, 1.0, %v148_v6  ;;  %v56_v9 = vsel %vm52_vm1, 1.0, %v148_v6 }
   0xf   :  { %v49_v8 = vand.u32 2147483647, %v47_v4  ;;  %v50_v10 = vand.u32 2147483647, %v48_v5  ;;  %v73_v11 = vadd.f32 %v56_v9, %v55_v7 }
  0x11   :  { %v53_v12 = vsel %vm51_vm0, %v49_v8, 0.0  ;;  %v57_v13 = vadd.f32 %v50_v10, %v49_v8  ;;  %v54_v14 = vsel %vm52_vm1, %v50_v10, 0.0  ;;  %v74_v15 = vrot.slane %v73_v11, 4 }
  0x12   :  { %v65_v16 = vadd.f32 %v54_v14, %v53_v12 }
  0x13   :  { %v58_v17 = vrot.slane %v57_v13, 4  ;;  %v75_v18 = vadd.f32 %v74_v15, %v73_v11 }
  0x14   :  { %v66_v19 = vrot.slane %v65_v16, 4 }
  0x15   :  { %v59_v20 = vadd.f32 %v58_v17, %v57_v13  ;;  %v76_v21 = vrot.slane %v75_v18, 2 }
  0x16   :  { %v67_v22 = vadd.f32 %v66_v19, %v65_v16 }
  0x17   :  { %v60_v23 = vrot.slane %v59_v20, 2  ;;  %v77_v24 = vadd.f32 %v76_v21, %v75_v18 }
  0x18   :  { %v68_v25 = vrot.slane %v67_v22, 2 }
  0x19   :  { %v61_v26 = vadd.f32 %v60_v23, %v59_v20  ;;  %v78_v27 = vrot.slane %v77_v24, 1 }
  0x1a   :  { %v69_v28 = vadd.f32 %v68_v25, %v67_v22 }
  0x1b   :  { %v62_v29 = vrot.slane %v61_v26, 1  ;;  %v79_v30 = vadd.f32 %v78_v27, %v77_v24 }
  0x1c   :  { %v70_v31 = vrot.slane %v69_v28, 1 }
  0x1d   :  { %v63_v32 = vadd.f32 %v62_v29, %v61_v26  ;;  %80 = vst [vmem:[%s181_s2 + $0x2] sm:$0x1] %v79_v30 }
  0x1e   :  { %v71_v33 = vadd.f32 %v70_v31, %v69_v28 }
  0x1f   :  { %64 = vst [vmem:[%s181_s2] sm:$0x1] %v63_v32 }
  0x20   :  { %72 = vst [vmem:[%s181_s2 + $0x1] sm:$0x1] %v71_v33 }
  0x21   :  { %85 = vsyncpa [#allocation3], 1 }
  0x22   :  { %86 = vsyncpa [#allocation5], 1 }

</bundles_post_ra>
